<compile_context>
chip_gen: v5e
topology: v5e:2x2
jax: 0.10.0
libtpu: 0.0.40
codegen_flags: <defaults>
</compile_context>

<pallas_src>
import functools

import jax
import jax.numpy as jnp
from jax.experimental import pallas as pl
from jax.experimental.pallas import tpu as pltpu


# -----------------------------------------------------------------------------
# Kernel 1: streaming global avg + max pool over H*W (the HBM-bound part)
# -----------------------------------------------------------------------------
def _pool_kernel(x_ref, avg_ref, max_ref, sum_acc, max_acc, *, inv_hw):
    # x_ref   : (1, Cb, T)  tile of the (B, C, H*W) view of NCHW x
    # avg_ref : (1, Cb, 1)  per-(batch, channel-block) average pool
    # max_ref : (1, Cb, 1)  per-(batch, channel-block) max pool
    # sum_acc, max_acc : (Cb, 1) f32 running accumulators (VMEM scratch)
    j = pl.program_id(2)

    @pl.when(j == 0)
    def _init():
        sum_acc[...] = jnp.zeros_like(sum_acc)
        max_acc[...] = jnp.full_like(max_acc, -jnp.inf)

    x = x_ref[0].astype(jnp.float32)                                  # (Cb, T)
    sum_acc[...] += jnp.sum(x, axis=-1, keepdims=True)                # (Cb, 1)
    max_acc[...] = jnp.maximum(max_acc[...],
                               jnp.max(x, axis=-1, keepdims=True))

    @pl.when(j == pl.num_programs(2) - 1)
    def _finalize():
        avg_ref[0] = (sum_acc[...] * inv_hw).astype(avg_ref.dtype)    # (Cb, 1)
        max_ref[0] = max_acc[...].astype(max_ref.dtype)


# -----------------------------------------------------------------------------
# Kernel 2: shared MLP + sigmoid, batched over all B (tiny, grid-less)
# -----------------------------------------------------------------------------
def _mlp_kernel(avg_ref, max_ref, w1_ref, w2_ref, out_ref):
    # avg_ref/max_ref: (B, C); w1_ref: (C, Ch); w2_ref: (Ch, C); out_ref: (B, C)
    b = out_ref.shape[0]
    pooled = jnp.concatenate([avg_ref[...], max_ref[...]], axis=0)    # (2B, C)
    h = jnp.dot(pooled, w1_ref[...], preferred_element_type=jnp.float32)
    h = jnp.maximum(h, 0.0)                                           # ReLU
    y = jnp.dot(h, w2_ref[...], preferred_element_type=jnp.float32)   # (2B, C)
    logits = y[:b] + y[b:]                                            # avg + max paths
    out_ref[...] = jax.nn.sigmoid(logits).astype(out_ref.dtype)


# -----------------------------------------------------------------------------
# Tiling helpers
# -----------------------------------------------------------------------------
def _vmem_capacity_bytes():
    try:
        info = pltpu.get_tpu_info()
        cap = getattr(info, "vmem_capacity_bytes", None)
        if cap:
            return int(cap)
    except Exception:
        pass
    return 64 * 1024 * 1024  # conservative default (v7x per-TC VMEM)


def _pick_channel_block(c):
    # Channels ride the sublane axis of the input block: Cb must be a multiple
    # of 8 or equal to C.  Splitting channels gives v7x a second parallel axis.
    for cb in (256, 128, 64):
        if c > cb and c % cb == 0:
            return cb
    return c


def _pick_hw_tile(hw, cb, itemsize, budget_bytes):
    # Largest multiple of 128 that divides HW and keeps one input tile within
    # budget_bytes (the tile is double-buffered by the pipeline).
    if hw % 128 != 0:
        # TODO(synk): ragged HW (not a multiple of 128) falls back to a single
        # full-extent block; a cdiv grid would need in-kernel masking of the
        # padded tail before the running max.
        return hw
    max_rows = max(128, budget_bytes // max(1, cb * itemsize))
    best, t = 128, 128
    while t <= hw and t <= max_rows:
        if hw % t == 0:
            best = t
        t += 128
    return best


# -----------------------------------------------------------------------------
# Wrapper
# -----------------------------------------------------------------------------
def channel_attention_pallas(x_nchw, fc1_w, fc2_w):
    """x_nchw: (B, C, H, W); fc1_w: (Ch, C, 1, 1); fc2_w: (C, Ch, 1, 1)."""
    B, C, H, W = x_nchw.shape
    HW = H * W

    # Free views (no HBM copies): NCHW is already (B, C, H*W)-contiguous, and
    # the 1x1 conv weights are plain matrices.
    x = x_nchw.reshape(B, C, HW)
    w1 = jnp.transpose(fc1_w[:, :, 0, 0])     # (C, Ch)
    w2 = jnp.transpose(fc2_w[:, :, 0, 0])     # (Ch, C)

    itemsize = jnp.dtype(x.dtype).itemsize
    cap = _vmem_capacity_bytes()
    tile_budget = min(cap // 8, 8 * 1024 * 1024)       # per-buffer input-tile budget
    Cb = _pick_channel_block(C)
    T = _pick_hw_tile(HW, Cb, itemsize, tile_budget)
    tile_bytes = Cb * T * itemsize
    vmem_limit = int(min(cap * 3 // 4,
                         max(16 * 1024 * 1024, 2 * tile_bytes + 4 * 1024 * 1024)))

    grid = (B, C // Cb, HW // T)

    cost = pl.CostEstimate(
        flops=2 * B * C * HW,                           # running sum + running max
        transcendentals=0,
        bytes_accessed=B * C * HW * itemsize + 2 * B * C * 4,
    )

    avg_pool, max_pool = pl.pallas_call(
        functools.partial(_pool_kernel, inv_hw=1.0 / HW),
        out_shape=(jax.ShapeDtypeStruct((B, C, 1), jnp.float32),
                   jax.ShapeDtypeStruct((B, C, 1), jnp.float32)),
        grid_spec=pltpu.PrefetchScalarGridSpec(
            num_scalar_prefetch=0,
            grid=grid,
            in_specs=[pl.BlockSpec((1, Cb, T), lambda b, c, j: (b, c, j))],
            out_specs=[pl.BlockSpec((1, Cb, 1), lambda b, c, j: (b, c, 0)),
                       pl.BlockSpec((1, Cb, 1), lambda b, c, j: (b, c, 0))],
            scratch_shapes=[pltpu.VMEM((Cb, 1), jnp.float32),   # running sum
                            pltpu.VMEM((Cb, 1), jnp.float32)],  # running max
        ),
        compiler_params=pltpu.CompilerParams(
            dimension_semantics=("parallel", "parallel", "arbitrary"),
            vmem_limit_bytes=vmem_limit),
        cost_estimate=cost,
    )(x)

    # Tiny shared MLP, batched over all B in one grid-less micro-kernel.
    avg2d = avg_pool.reshape(B, C)
    max2d = max_pool.reshape(B, C)
    out = pl.pallas_call(
        _mlp_kernel,
        out_shape=jax.ShapeDtypeStruct((B, C), jnp.float32),
    )(avg2d, max2d, w1, w2)

    return out.reshape(B, C, 1, 1)   # match the PyTorch output shape


# -----------------------------------------------------------------------------
# Pure-JAX reference (mirrors the PyTorch forward)
# -----------------------------------------------------------------------------
def reference(x_nchw, fc1_w, fc2_w):
    avg = jnp.mean(x_nchw, axis=(2, 3))                 # (B, C)
    mx = jnp.max(x_nchw, axis=(2, 3))                   # (B, C)
    w1m = fc1_w[:, :, 0, 0]                             # (Ch, C)
    w2m = fc2_w[:, :, 0, 0]                             # (C, Ch)

    def mlp(v):
        h = jnp.maximum(v @ w1m.T, 0.0)
        return h @ w2m.T

    out = jax.nn.sigmoid(mlp(avg) + mlp(mx))            # (B, C)
    B, C = out.shape
    return out.reshape(B, C, 1, 1)


# -----------------------------------------------------------------------------
if __name__ == "__main__":
    B, C, H, W = 2, 64, 16, 16
    ratio = 16
    Ch = C // ratio

    key = jax.random.PRNGKey(0)
    k_x, k_w1, k_w2 = jax.random.split(key, 3)

    x = jax.random.normal(k_x, (B, C, H, W), jnp.float32)              # NCHW, as in PyTorch
    fc1_w = 0.3 * jax.random.normal(k_w1, (Ch, C, 1, 1), jnp.float32)  # OIHW 1x1 conv
    fc2_w = 0.3 * jax.random.normal(k_w2, (C, Ch, 1, 1), jnp.float32)  # OIHW 1x1 conv

    out = jax.block_until_ready(channel_attention_pallas(x, fc1_w, fc2_w))

    ref = reference(x, fc1_w, fc2_w)
    assert out.shape == ref.shape == (B, C, 1, 1)
    max_err = float(jnp.max(jnp.abs(out - ref)))
    assert max_err < 1e-4, f"mismatch vs reference, max abs err={max_err}"

    print("KERNEL_OK")
</pallas_src>

<mosaic_0001>
module attributes {stable_mosaic.version = 11 : i64} {
  func.func @_pool_kernel(%arg0: i32, %arg1: i32, %arg2: i32, %arg3: memref<1x64x256xf32, #tpu.memory_space<vmem>>, %arg4: memref<1x64x1xf32, #tpu.memory_space<vmem>>, %arg5: memref<1x64x1xf32, #tpu.memory_space<vmem>>, %arg6: memref<64x1xf32, #tpu.memory_space<vmem>>, %arg7: memref<64x1xf32, #tpu.memory_space<vmem>>) attributes {dimension_semantics = [#tpu.dimension_semantics<parallel>, #tpu.dimension_semantics<parallel>, #tpu.dimension_semantics<arbitrary>], iteration_bounds = array<i64: 2, 1, 1>, scalar_prefetch = 0 : i64, scratch_operands = 2 : i64, tpu.core_type = #tpu.core_type<tc>, window_params = [{transform_indices = @transform_0, window_bounds = array<i64: 1, 64, 256>}, {transform_indices = @transform_1, window_bounds = array<i64: 1, 64, 1>}, {transform_indices = @transform_2, window_bounds = array<i64: 1, 64, 1>}]} {
    %c0_i32 = arith.constant 0 : i32
    %0 = arith.cmpi eq, %arg2, %c0_i32 : i32
    %1 = arith.extui %0 : i1 to i32
    %c0_i32_0 = arith.constant 0 : i32
    %2 = arith.cmpi ne, %1, %c0_i32_0 : i32
    scf.if %2 {
      %cst_14 = arith.constant 0.000000e+00 : f32
      %18 = vector.broadcast %cst_14 : f32 to vector<64x1xf32>
      %c0_15 = arith.constant 0 : index
      %c0_16 = arith.constant 0 : index
      %19 = vector.load %arg6[%c0_15, %c0_16] : memref<64x1xf32, #tpu.memory_space<vmem>>, vector<64x1xf32>
      tpu.vector_store %arg6[%c0_15, %c0_16], %18 {strides = array<i32>} : memref<64x1xf32, #tpu.memory_space<vmem>>, vector<64x1xf32>,
      %cst_17 = arith.constant 0xFF800000 : f32
      %20 = vector.broadcast %cst_17 : f32 to vector<64x1xf32>
      %c0_18 = arith.constant 0 : index
      %c0_19 = arith.constant 0 : index
      %21 = vector.load %arg7[%c0_18, %c0_19] : memref<64x1xf32, #tpu.memory_space<vmem>>, vector<64x1xf32>
      tpu.vector_store %arg7[%c0_18, %c0_19], %20 {strides = array<i32>} : memref<64x1xf32, #tpu.memory_space<vmem>>, vector<64x1xf32>,
    } else {
    }
    %c0 = arith.constant 0 : index
    %c0_1 = arith.constant 0 : index
    %c0_2 = arith.constant 0 : index
    %3 = vector.load %arg3[%c0, %c0_1, %c0_2] : memref<1x64x256xf32, #tpu.memory_space<vmem>>, vector<1x64x256xf32>
    %4 = vector.shape_cast %3 : vector<1x64x256xf32> to vector<64x256xf32>
    %c0_3 = arith.constant 0 : index
    %c0_4 = arith.constant 0 : index
    %5 = vector.load %arg6[%c0_3, %c0_4] : memref<64x1xf32, #tpu.memory_space<vmem>>, vector<64x1xf32>
    %cst = arith.constant dense<0.000000e+00> : vector<64xf32>
    %6 = vector.multi_reduction <add>, %4, %cst [1] : vector<64x256xf32> to vector<64xf32>
    %7 = vector.shape_cast %6 : vector<64xf32> to vector<64x1xf32>
    %8 = arith.addf %5, %7 : vector<64x1xf32>
    %c0_5 = arith.constant 0 : index
    %c0_6 = arith.constant 0 : index
    %9 = vector.load %arg6[%c0_5, %c0_6] : memref<64x1xf32, #tpu.memory_space<vmem>>, vector<64x1xf32>
    tpu.vector_store %arg6[%c0_5, %c0_6], %8 {strides = array<i32>} : memref<64x1xf32, #tpu.memory_space<vmem>>, vector<64x1xf32>,
    %c0_7 = arith.constant 0 : index
    %c0_8 = arith.constant 0 : index
    %10 = vector.load %arg7[%c0_7, %c0_8] : memref<64x1xf32, #tpu.memory_space<vmem>>, vector<64x1xf32>
    %cst_9 = arith.constant dense<0xFF800000> : vector<64xf32>
    %11 = vector.multi_reduction <maximumf>, %4, %cst_9 [1] : vector<64x256xf32> to vector<64xf32>
    %12 = vector.shape_cast %11 : vector<64xf32> to vector<64x1xf32>
    %13 = arith.maximumf %10, %12 : vector<64x1xf32>
    %c0_10 = arith.constant 0 : index
    %c0_11 = arith.constant 0 : index
    %14 = vector.load %arg7[%c0_10, %c0_11] : memref<64x1xf32, #tpu.memory_space<vmem>>, vector<64x1xf32>
    tpu.vector_store %arg7[%c0_10, %c0_11], %13 {strides = array<i32>} : memref<64x1xf32, #tpu.memory_space<vmem>>, vector<64x1xf32>,
    %c0_i32_12 = arith.constant 0 : i32
    %15 = arith.cmpi eq, %arg2, %c0_i32_12 : i32
    %16 = arith.extui %15 : i1 to i32
    %c0_i32_13 = arith.constant 0 : i32
    %17 = arith.cmpi ne, %16, %c0_i32_13 : i32
    scf.if %17 {
      %c0_14 = arith.constant 0 : index
      %c0_15 = arith.constant 0 : index
      %18 = vector.load %arg6[%c0_14, %c0_15] : memref<64x1xf32, #tpu.memory_space<vmem>>, vector<64x1xf32>
      %cst_16 = arith.constant 3.906250e-03 : f32
      %19 = vector.broadcast %cst_16 : f32 to vector<64x1xf32>
      %20 = arith.mulf %18, %19 : vector<64x1xf32>
      %c0_17 = arith.constant 0 : index
      %c0_18 = arith.constant 0 : index
      %c0_19 = arith.constant 0 : index
      %21 = vector.load %arg4[%c0_17, %c0_18, %c0_19] : memref<1x64x1xf32, #tpu.memory_space<vmem>>, vector<1x64x1xf32>
      %22 = vector.shape_cast %21 : vector<1x64x1xf32> to vector<64x1xf32>
      %23 = vector.shape_cast %20 : vector<64x1xf32> to vector<1x64x1xf32>
      tpu.vector_store %arg4[%c0_17, %c0_18, %c0_19], %23 {strides = array<i32>} : memref<1x64x1xf32, #tpu.memory_space<vmem>>, vector<1x64x1xf32>,
      %c0_20 = arith.constant 0 : index
      %c0_21 = arith.constant 0 : index
      %24 = vector.load %arg7[%c0_20, %c0_21] : memref<64x1xf32, #tpu.memory_space<vmem>>, vector<64x1xf32>
      %c0_22 = arith.constant 0 : index
      %c0_23 = arith.constant 0 : index
      %c0_24 = arith.constant 0 : index
      %25 = vector.load %arg5[%c0_22, %c0_23, %c0_24] : memref<1x64x1xf32, #tpu.memory_space<vmem>>, vector<1x64x1xf32>
      %26 = vector.shape_cast %25 : vector<1x64x1xf32> to vector<64x1xf32>
      %27 = vector.shape_cast %24 : vector<64x1xf32> to vector<1x64x1xf32>
      tpu.vector_store %arg5[%c0_22, %c0_23, %c0_24], %27 {strides = array<i32>} : memref<1x64x1xf32, #tpu.memory_space<vmem>>, vector<1x64x1xf32>,
    } else {
    }
    return
  }
  func.func @transform_0(%arg0: i32, %arg1: i32, %arg2: i32) -> (i32, i32, i32) {
    %c0_i32 = arith.constant 0 : i32
    return %arg0, %arg1, %arg2 : i32, i32, i32
  }
  func.func @transform_1(%arg0: i32, %arg1: i32, %arg2: i32) -> (i32, i32, i32) {
    %c0_i32 = arith.constant 0 : i32
    %c0_i32_0 = arith.constant 0 : i32
    return %arg0, %arg1, %c0_i32 : i32, i32, i32
  }
  func.func @transform_2(%arg0: i32, %arg1: i32, %arg2: i32) -> (i32, i32, i32) {
    %c0_i32 = arith.constant 0 : i32
    %c0_i32_0 = arith.constant 0 : i32
    return %arg0, %arg1, %c0_i32 : i32, i32, i32
  }
}

</mosaic_0001>

<bundles_post_ra>
// kernel: tpu_custom_call.1
= control target key start
LH: loop header
LB: loop body
LE: loop exit
PB: predicated region body
PF: predicated region fallthrough
CT: control target
= control target key end

     0   :  { %8 = vsyncpa [#allocation5], 0  ;;  %s920_s0 = inlined_call_operand.hbm [shape: f32[2,64,256], index: 0, kind: input, shape index: {}]   ;;  %s921_s1 = inlined_call_operand.vmem [shape: f32[2,64,1], index: 1, kind: output, shape index: {0}]   ;;  %s922_s2 = inlined_call_operand.vmem [shape: f32[2,64,1], index: 2, kind: output, shape index: {1}]  }
   0x1   :  { %10 = vsyncpa [#allocation5 + $0x1], 0  ;;  %s736_s9 = smov 0   ;;  %s738_s10 = smov 0  }
   0x2   :  { %s740_s11 = smov 0   ;;  %s742_s12 = smov 0  }
   0x3   :  { %s744_s13 = smov 0   ;;  %s746_s14 = smov 0  }
   0x4 LB: > { %s558_s15 = sadd.s32 4294967295, %s715_s14   ;;  %s35_s16 = sadd.s32 1, %s711_s13  ;;  %s715_s14 = sphi %s746_s14, %s16_s14   ;;  %s711_s13 = sphi %s744_s13, %s929_s13   ;;  %s707_s12 = sphi %s742_s12, %s928_s12   ;;  %s703_s11 = sphi %s740_s11, %s927_s11   ;;  %s699_s10 = sphi %s738_s10, %s926_s10   ;;  %s695_s9 = sphi %s736_s9, %s925_s9  }
   0x5   : > { %p37_p0 = scmp.ge.s32.totalorder %s35_s16, 2  ;;  %s46_s17 = sadd.s32 1, %s703_s11 }
   0x6   : > { %p53_p1 = scmp.ne.s32.totalorder %s703_s11, %s699_s10  ;;  %p54_p2 = scmp.eq.s32.totalorder %s715_s14, 0 }
   0x7   : > { %s931_s16 = smov (%p37_p0, %s35_s16), 0  ;;  %p59_p4 = scmp.ne.s32.totalorder %s699_s10, %s695_s9 }
   0x8   : > { %p772_p3 = por %p54_p2, %p53_p1  ;;  %s39_s19 = ssub.s32 %s711_s13, %s931_s16 }
   0x9   : > { %p60_p5 = scmp.eq.s32.totalorder %s558_s15, 0  ;;  %p44_p6 = scmp.eq.s32.totalorder %s39_s19, 0 }
   0xa   : > { %p582_p8 = scmp.lt.s32.totalorder %s715_s14, 2  ;;  %s139_s22 = sand.u32 1, %s703_s11  }
   0xb   : > { %p779_p7 = por %p60_p5, %p59_p4  ;;  %s573_s23 = sshll.u32 %s711_s13, 7 }
   0xc   : > { %s785_s21 = scalar_select %p44_p6, %s703_s11, %s46_s17  }
   0xd   : > { %s562_s24 = sshll.u32 %s139_s22, 7  ;;  %s153_s27 = scalar_lea.hbm %s920_s0, %s573_s23 }
   0xe   : > { %s154_s28 = sshll.u32 %s153_s27, 4  ;;  %s143_s29 = scalar_lea.vmem [#allocation4], %s562_s24  ;;  %s155_s28 = int_to_ptr.hbm [resolvable:$true] %s154_s28 }
   0xf   : > { %s156_s30 = sshll.u32 %s143_s29, 4  ;;  %p579_p9 = pnand %p582_p8, %p772_p3  ;;  %s157_s30 = int_to_ptr.vmem [resolvable:$true] %s156_s30 }
  0x10   : > { %p565_p10 = scmp.ge.s32.totalorder %s715_s14, 1  ;;  %p164_p11 = scmp.lt.s32.totalorder %s715_s14, 3 }
  0x11   : > { %s140_s3 = scalar_lea.sflag [#allocation5], %s139_s22  ;;  %s717_s4 = smov 256  }
  0x12   : > { %s718_s5 = smov 16   ;;  %p165_p12 = pnand %p565_p10, %p164_p11 }
  0x13   : > { %581 = dma.hbm_to_vmem [thread:$0]  (!%p579_p9), %s155_s28, 2048, %s157_s30, %s140_s3, %s717_s4, %s717_s4, %s718_s5  }
  0x14   : > { %168 = sbr.rel (%p165_p12) target bundleno = 196 (0xc4), region = 24  ;;  %s170_s6 = sand.u32 (!%p165_p12), 1, %s699_s10  }
  0x15   : > { %s566_s7 = sshll.u32 (!%p165_p12), %s170_s6, 7  ;;  %s171_s8 = scalar_lea.sflag (!%p165_p12), [#allocation5], %s170_s6 }
  0x16   : > { %s797_s9 = scalar_lea.vmem (!%p165_p12), [#allocation4], %s566_s7 }
  0x19   : > { %690 = dma.done.wait (%p779_p7), %s171_s8, 2048  }
  0x1a   : > { %692 = vsyncadd (%p779_p7), %s171_s8, 4294965248  ;;  %v252_v0 = vld [vmem:[%s797_s9] sm:$0xff]  ;;  %v253_v1 = vld [vmem:[%s797_s9 + $0x8] sm:$0xff]  ;;  %vm235_vm0 = vcmask 7168   ;;  %v719_v20 = vmov 0.0   ;;  %v720_v33 = vmov -inf  }
  0x1b   : > { %v260_v2 = vld [vmem:[%s797_s9 + $0x40] sm:$0xff]  ;;  %v276_v3 = vadd.f32 %v253_v1, %v252_v0  ;;  %v261_v4 = vld [vmem:[%s797_s9 + $0x48] sm:$0xff]  ;;  %v254_v9 = vld [vmem:[%s797_s9 + $0x10] sm:$0xff]  ;;  %236 = vst.msk [vmem:[#allocation2] sm:$0xff] %vm235_vm0, %v719_v20  ;;  %v325_v25 = vmax.f32 %v252_v0, %v253_v1  ;;  %p212_p13 = scmp.lt.s32.totalorder %s707_s12, 1 }
  0x1c   : > { %v256_v5 = vld [vmem:[%s797_s9 + $0x20] sm:$0xff]  ;;  %v257_v6 = vld [vmem:[%s797_s9 + $0x28] sm:$0xff]  ;;  %v288_v7 = vadd.f32 %v261_v4, %v260_v2  ;;  %v255_v10 = vld [vmem:[%s797_s9 + $0x18] sm:$0xff]  ;;  %237 = vst.msk [vmem:[#allocation2 + $0x8] sm:$0xff] %vm235_vm0, %v719_v20  ;;  %v337_v29 = vmax.f32 %v260_v2, %v261_v4 }
  0x1d   : > { %v282_v8 = vadd.f32 %v257_v6, %v256_v5  ;;  %277 = vadd.xlane.f32.xlu0 %v276_v3  ;;  %v262_v11 = vld [vmem:[%s797_s9 + $0x50] sm:$0xff]  ;;  %v263_v12 = vld [vmem:[%s797_s9 + $0x58] sm:$0xff]  ;;  %v279_v15 = vadd.f32 %v255_v10, %v254_v9  ;;  %v264_v18 = vld [vmem:[%s797_s9 + $0x60] sm:$0xff]  ;;  %238 = vst.msk [vmem:[#allocation2 + $0x10] sm:$0xff] %vm235_vm0, %v719_v20  ;;  %v328_v26 = vmax.f32 %v254_v9, %v255_v10  ;;  %s933_s12 = smov (!%p212_p13, %s707_s12), 1 }
  0x1e   : > { %289 = vadd.xlane.f32.xlu2 %v288_v7  ;;  %v258_v13 = vld [vmem:[%s797_s9 + $0x30] sm:$0xff]  ;;  %v259_v14 = vld [vmem:[%s797_s9 + $0x38] sm:$0xff]  ;;  %v291_v16 = vadd.f32 %v263_v12, %v262_v11  ;;  %v265_v19 = vld [vmem:[%s797_s9 + $0x68] sm:$0xff]  ;;  %239 = vst.msk [vmem:[#allocation2 + $0x18] sm:$0xff] %vm235_vm0, %v719_v20  ;;  %v331_v27 = vmax.f32 %v256_v5, %v257_v6  ;;  %v340_v30 = vmax.f32 %v262_v11, %v263_v12  ;;  %s574_s15 = sshll.u32 %s933_s12, 6 }
  0x1f   : > { %283 = vadd.xlane.f32.xlu1 %v282_v8  ;;  %v285_v17 = vadd.f32 %v259_v14, %v258_v13  ;;  %v266_v21 = vld [vmem:[%s797_s9 + $0x70] sm:$0xff]  ;;  %v267_v22 = vld [vmem:[%s797_s9 + $0x78] sm:$0xff]  ;;  %v294_v23 = vadd.f32 %v265_v19, %v264_v18  ;;  %240 = vst.msk [vmem:[#allocation2 + $0x20] sm:$0xff] %vm235_vm0, %v719_v20  ;;  %v334_v28 = vmax.f32 %v258_v13, %v259_v14  ;;  %s848_s19 = scalar_lea.vmem %s921_s1, %s574_s15  ;;  %s874_s23 = scalar_lea.vmem %s922_s2, %s574_s15 }
  0x20   : > { %v297_v24 = vadd.f32 %v267_v22, %v266_v21  ;;  %241 = vst.msk [vmem:[#allocation2 + $0x28] sm:$0xff] %vm235_vm0, %v719_v20  ;;  %v343_v31 = vmax.f32 %v264_v18, %v265_v19  ;;  %v346_v32 = vmax.f32 %v266_v21, %v267_v22 }
  0x21   : > { %242 = vst.msk [vmem:[#allocation2 + $0x30] sm:$0xff] %vm235_vm0, %v719_v20 }
  0x22   : > { %243 = vst.msk [vmem:[#allocation2 + $0x38] sm:$0xff] %vm235_vm0, %v719_v20  ;;  %v268_v34 = vld [vmem:[#allocation2] sm:$0xff] }
  0x23   : > { %244 = vst.msk [vmem:[#allocation3] sm:$0xff] %vm235_vm0, %v720_v33  ;;  %v269_v43 = vld [vmem:[#allocation2 + $0x8] sm:$0xff] }
  0x24   : > { %245 = vst.msk [vmem:[#allocation3 + $0x8] sm:$0xff] %vm235_vm0, %v720_v33  ;;  %v270_v36 = vld [vmem:[#allocation2 + $0x10] sm:$0xff] }
  0x25   : > { %280 = vadd.xlane.f32.xlu0 %v279_v15  ;;  %246 = vst.msk [vmem:[#allocation3 + $0x10] sm:$0xff] %vm235_vm0, %v720_v33  ;;  %v271_v49 = vld [vmem:[#allocation2 + $0x18] sm:$0xff] }
  0x26   : > { %292 = vadd.xlane.f32.xlu2 %v291_v16  ;;  %247 = vst.msk [vmem:[#allocation3 + $0x18] sm:$0xff] %vm235_vm0, %v720_v33  ;;  %v272_v35 = vld [vmem:[#allocation2 + $0x20] sm:$0xff] }
  0x27   : > { %286 = vadd.xlane.f32.xlu1 %v285_v17  ;;  %248 = vst.msk [vmem:[#allocation3 + $0x20] sm:$0xff] %vm235_vm0, %v720_v33  ;;  %v273_v44 = vld [vmem:[#allocation2 + $0x28] sm:$0xff] }
  0x28   : > { %249 = vst.msk [vmem:[#allocation3 + $0x28] sm:$0xff] %vm235_vm0, %v720_v33  ;;  %v274_v58 = vld [vmem:[#allocation2 + $0x30] sm:$0xff] }
  0x29   : > { %250 = vst.msk [vmem:[#allocation3 + $0x30] sm:$0xff] %vm235_vm0, %v720_v33  ;;  %v275_v59 = vld [vmem:[#allocation2 + $0x38] sm:$0xff] }
  0x2a   : > { %251 = vst.msk [vmem:[#allocation3 + $0x38] sm:$0xff] %vm235_vm0, %v720_v33  ;;  %v317_v61 = vld [vmem:[#allocation3] sm:$0xff] }
  0x2b   : > { %v318_v7 = vld [vmem:[#allocation3 + $0x8] sm:$0xff] }
  0x2c   : > { %v319_v9 = vld [vmem:[#allocation3 + $0x10] sm:$0xff] }
  0x2d   : > { %295 = vadd.xlane.f32.xlu0 %v294_v23  ;;  %v320_v15 = vld [vmem:[#allocation3 + $0x18] sm:$0xff] }
  0x2e   : > { %326 = vmax.xlane.f32.xlu2 %v325_v25  ;;  %v321_v23 = vld [vmem:[#allocation3 + $0x20] sm:$0xff] }
  0x2f   : > { %298 = vadd.xlane.f32.xlu1 %v297_v24  ;;  %v322_v24 = vld [vmem:[#allocation3 + $0x28] sm:$0xff] }
  0x35   : > { %329 = vmax.xlane.f32.xlu0 %v328_v26  ;;  %v323_v26 = vld [vmem:[#allocation3 + $0x30] sm:$0xff] }
  0x36   : > { %335 = vmax.xlane.f32.xlu2 %v334_v28 }
  0x37   : > { %332 = vmax.xlane.f32.xlu1 %v331_v27 }
  0x3d   : > { %338 = vmax.xlane.f32.xlu0 %v337_v29 }
  0x3e   : > { %344 = vmax.xlane.f32.xlu2 %v343_v31 }
  0x3f   : > { %341 = vmax.xlane.f32.xlu1 %v340_v30 }
  0x45   : > { %347 = vmax.xlane.f32.xlu0 %v346_v32 }
  0x90   : > { %v278_v37 = vpop.xlane.xlu0 %277 }
  0x91   : > { %v300_v38 = vadd.f32 %v278_v37, %v268_v34  ;;  %v290_v39 = vpop.xlane.xlu2 %289  ;;  %v324_v34 = vld [vmem:[#allocation3 + $0x38] sm:$0xff] }
  0x92   : > { %v284_v40 = vpop.xlane.xlu1 %283  ;;  %v304_v41 = vadd.f32 %v290_v39, %v272_v35 }
  0x93   : > { %v302_v42 = vadd.f32 %v284_v40, %v270_v36  ;;  %309 = vst.msk [vmem:[#allocation2] sm:$0xff] %vm235_vm0, %v300_v38 }
  0x94   : > { %313 = vst.msk [vmem:[#allocation2 + $0x20] sm:$0xff] %vm235_vm0, %v304_v41 }
  0x95   : > { %311 = vst.msk [vmem:[#allocation2 + $0x10] sm:$0xff] %vm235_vm0, %v302_v42 }
  0x98   : > { %v281_v45 = vpop.xlane.xlu0 %280 }
  0x99   : > { %v301_v46 = vadd.f32 %v281_v45, %v269_v43  ;;  %v293_v47 = vpop.xlane.xlu2 %292 }
  0x9a   : > { %v287_v48 = vpop.xlane.xlu1 %286  ;;  %v368_v50 = vld [vmem:[#allocation2] sm:$0xff]  ;;  %v305_v51 = vadd.f32 %v293_v47, %v273_v44 }
  0x9b   : > { %v376_v52 = vmul.f32 0.00390625, %v368_v50  ;;  %v372_v53 = vld [vmem:[#allocation2 + $0x20] sm:$0xff]  ;;  %310 = vst.msk [vmem:[#allocation2 + $0x8] sm:$0xff] %vm235_vm0, %v301_v46  ;;  %v303_v56 = vadd.f32 %v287_v48, %v271_v49 }
  0x9c   : > { %v380_v54 = vmul.f32 0.00390625, %v372_v53  ;;  %v370_v55 = vld [vmem:[#allocation2 + $0x10] sm:$0xff]  ;;  %314 = vst.msk [vmem:[#allocation2 + $0x28] sm:$0xff] %vm235_vm0, %v305_v51 }
  0x9d   : > { %384 = vst.msk [vmem:[%s848_s19] sm:$0xff] %vm235_vm0, %v376_v52  ;;  %v378_v57 = vmul.f32 0.00390625, %v370_v55 }
  0x9e   : > { %388 = vst.msk [vmem:[%s848_s19 + $0x20] sm:$0xff] %vm235_vm0, %v380_v54 }
  0x9f   : > { %386 = vst.msk [vmem:[%s848_s19 + $0x10] sm:$0xff] %vm235_vm0, %v378_v57 }
  0xa0   : > { %312 = vst.msk [vmem:[#allocation2 + $0x18] sm:$0xff] %vm235_vm0, %v303_v56  ;;  %v296_v60 = vpop.xlane.xlu0 %295 }
  0xa1   : > { %v306_v62 = vadd.f32 %v296_v60, %v274_v58  ;;  %v327_v0 = vpop.xlane.xlu2 %326 }
  0xa2   : > { %v299_v63 = vpop.xlane.xlu1 %298  ;;  %v369_v1 = vld [vmem:[#allocation2 + $0x8] sm:$0xff]  ;;  %v349_v5 = vmax.f32 %v317_v61, %v327_v0 }
  0xa3   : > { %v307_v2 = vadd.f32 %v299_v63, %v275_v59  ;;  %v377_v3 = vmul.f32 0.00390625, %v369_v1  ;;  %v373_v4 = vld [vmem:[#allocation2 + $0x28] sm:$0xff]  ;;  %315 = vst.msk [vmem:[#allocation2 + $0x30] sm:$0xff] %vm235_vm0, %v306_v62 }
  0xa4   : > { %v381_v6 = vmul.f32 0.00390625, %v373_v4  ;;  %357 = vst.msk [vmem:[#allocation3] sm:$0xff] %vm235_vm0, %v349_v5 }
  0xa5   : > { %316 = vst.msk [vmem:[#allocation2 + $0x38] sm:$0xff] %vm235_vm0, %v307_v2 }
  0xa6   : > { %385 = vst.msk [vmem:[%s848_s19 + $0x8] sm:$0xff] %vm235_vm0, %v377_v3 }
  0xa7   : > { %389 = vst.msk [vmem:[%s848_s19 + $0x28] sm:$0xff] %vm235_vm0, %v381_v6  ;;  %v371_v8 = vld [vmem:[#allocation2 + $0x18] sm:$0xff] }
  0xa8   : > { %v379_v10 = vmul.f32 0.00390625, %v371_v8  ;;  %v330_v11 = vpop.xlane.xlu0 %329 }
  0xa9   : > { %v350_v12 = vmax.f32 %v318_v7, %v330_v11  ;;  %v336_v14 = vpop.xlane.xlu2 %335 }
  0xaa   : > { %v333_v13 = vpop.xlane.xlu1 %332  ;;  %387 = vst.msk [vmem:[%s848_s19 + $0x18] sm:$0xff] %vm235_vm0, %v379_v10  ;;  %v374_v16 = vld [vmem:[#allocation2 + $0x30] sm:$0xff]  ;;  %v352_v21 = vmax.f32 %v320_v15, %v336_v14 }
  0xab   : > { %v351_v17 = vmax.f32 %v319_v9, %v333_v13  ;;  %v382_v18 = vmul.f32 0.00390625, %v374_v16  ;;  %358 = vst.msk [vmem:[#allocation3 + $0x8] sm:$0xff] %vm235_vm0, %v350_v12  ;;  %v392_v22 = vld [vmem:[#allocation3] sm:$0xff] }
  0xac   : > { %v375_v19 = vld [vmem:[#allocation2 + $0x38] sm:$0xff]  ;;  %400 = vst.msk [vmem:[%s874_s23] sm:$0xff] %vm235_vm0, %v392_v22 }
  0xad   : > { %v383_v20 = vmul.f32 0.00390625, %v375_v19  ;;  %359 = vst.msk [vmem:[#allocation3 + $0x10] sm:$0xff] %vm235_vm0, %v351_v17 }
  0xae   : > { %390 = vst.msk [vmem:[%s848_s19 + $0x30] sm:$0xff] %vm235_vm0, %v382_v18 }
  0xaf   : > { %391 = vst.msk [vmem:[%s848_s19 + $0x38] sm:$0xff] %vm235_vm0, %v383_v20 }
  0xb0   : > { %360 = vst.msk [vmem:[#allocation3 + $0x18] sm:$0xff] %vm235_vm0, %v352_v21  ;;  %v339_v25 = vpop.xlane.xlu0 %338 }
  0xb1   : > { %v353_v27 = vmax.f32 %v321_v23, %v339_v25  ;;  %v345_v29 = vpop.xlane.xlu2 %344 }
  0xb2   : > { %v342_v28 = vpop.xlane.xlu1 %341  ;;  %v393_v30 = vld [vmem:[#allocation3 + $0x8] sm:$0xff]  ;;  %v355_v33 = vmax.f32 %v323_v26, %v345_v29 }
  0xb3   : > { %v354_v31 = vmax.f32 %v322_v24, %v342_v28  ;;  %401 = vst.msk [vmem:[%s874_s23 + $0x8] sm:$0xff] %vm235_vm0, %v393_v30 }
  0xb4   : > { %v394_v32 = vld [vmem:[#allocation3 + $0x10] sm:$0xff]  ;;  %361 = vst.msk [vmem:[#allocation3 + $0x20] sm:$0xff] %vm235_vm0, %v353_v27 }
  0xb5   : > { %402 = vst.msk [vmem:[%s874_s23 + $0x10] sm:$0xff] %vm235_vm0, %v394_v32 }
  0xb6   : > { %362 = vst.msk [vmem:[#allocation3 + $0x28] sm:$0xff] %vm235_vm0, %v354_v31 }
  0xb7   : > { %v395_v35 = vld [vmem:[#allocation3 + $0x18] sm:$0xff]  ;;  %363 = vst.msk [vmem:[#allocation3 + $0x30] sm:$0xff] %vm235_vm0, %v355_v33 }
  0xb8   : > { %403 = vst.msk [vmem:[%s874_s23 + $0x18] sm:$0xff] %vm235_vm0, %v395_v35  ;;  %v348_v36 = vpop.xlane.xlu0 %347 }
  0xb9   : > { %v356_v37 = vmax.f32 %v324_v34, %v348_v36 }
  0xbb   : > { %364 = vst.msk [vmem:[#allocation3 + $0x38] sm:$0xff] %vm235_vm0, %v356_v37  ;;  %v396_v38 = vld [vmem:[#allocation3 + $0x20] sm:$0xff] }
  0xbc   : > { %404 = vst.msk [vmem:[%s874_s23 + $0x20] sm:$0xff] %vm235_vm0, %v396_v38 }
  0xbd   : > { %v397_v39 = vld [vmem:[#allocation3 + $0x28] sm:$0xff] }
  0xbe   : > { %405 = vst.msk [vmem:[%s874_s23 + $0x28] sm:$0xff] %vm235_vm0, %v397_v39  ;;  %v398_v40 = vld [vmem:[#allocation3 + $0x30] sm:$0xff] }
  0xbf   : > { %406 = vst.msk [vmem:[%s874_s23 + $0x30] sm:$0xff] %vm235_vm0, %v398_v40 }
  0xc2   : > { %v399_v41 = vld [vmem:[#allocation3 + $0x38] sm:$0xff] }
  0xc3   : > { %407 = vst.msk [vmem:[%s874_s23 + $0x38] sm:$0xff] %vm235_vm0, %v399_v41 }
  0xc4 PF: > { %s16_s14 = sadd.s32 1, %s715_s14   ;;  %s925_s9 = smov %s699_s10 }
  0xc5   : > { %p13_p0 = scmp.ge.s32.totalorder %s16_s14, 4   ;;  %s926_s10 = smov %s703_s11 }
  0xc6   : > { %s927_s11 = smov %s785_s21  ;;  %s928_s12 = smov %s711_s13 }
  0xc7   : > { %s929_s13 = smov %s931_s16  ;;  %15 = sbr.rel (!%p13_p0) target bundleno = 4 (0x4), region = 84 }
  0xcc   :  { %463 = vsyncpa [#allocation5], 1 }
  0xcd   :  { %465 = vsyncpa [#allocation5 + $0x1], 1 }

</bundles_post_ra>
